<compile_context>
chip_gen: v7x
topology: tpu7x:2x2x1
jax: 0.10.0
libtpu: 0.0.40
codegen_flags: <defaults>
</compile_context>

<pallas_src>
import jax
import jax.numpy as jnp
from jax import lax
from jax.experimental import pallas as pl
from jax.experimental.pallas import tpu as pltpu

N_EMBED = 384
BLOCK_SIZE = 256  # causal-mask buffer size in the PyTorch module (we only need T <= 256)


def _head_kernel(x_ref, w_ref, o_ref):
    # x_ref: (Bb, T, C) f32 block of sequences.
    # w_ref: (C, 3H) bf16 fused projection weights, concatenated as [key | query | value].
    # o_ref: (Bb, T, H) output in the module's native layout.
    x = x_ref[...].astype(jnp.bfloat16)  # cast in VMEM: DMA f32 once, MXU consumes bf16
    w = w_ref[...]                       # bf16 (C, 3H)
    Bb, T, C = x.shape
    H = w.shape[1] // 3

    # One fused MXU pass for the three projections (N = 3H = 192 instead of 3 passes at N = 64).
    kqv = jnp.dot(x.reshape(Bb * T, C), w,
                  preferred_element_type=jnp.float32).reshape(Bb, T, 3 * H)

    scale = H ** (-0.5)                                       # 1/8 for H=64: exact power of two
    k = kqv[:, :, 0:H].astype(jnp.bfloat16)                   # (Bb, T, H)
    q = (kqv[:, :, H:2 * H] * scale).astype(jnp.bfloat16)     # scale folded into q (T*H mults)
    v = kqv[:, :, 2 * H:3 * H].astype(jnp.bfloat16)           # (Bb, T, H)

    # scores = (q * scale) @ k^T, contracting the head dim directly (no materialized transpose).
    wei = jnp.einsum('bqh,bkh->bqk', q, k,
                     preferred_element_type=jnp.float32)      # (Bb, T, T) f32

    # causal mask == masked_fill(tril[:T, :T] == 0, -inf)
    row = lax.broadcasted_iota(jnp.int32, wei.shape, 1)
    col = lax.broadcasted_iota(jnp.int32, wei.shape, 2)
    wei = jnp.where(col <= row, wei, -jnp.inf)

    # numerically-stable softmax in f32; approx reciprocal runs on the EUP (free slot).
    wei = wei - jnp.max(wei, axis=-1, keepdims=True)
    p = jnp.exp(wei)
    p = p * pl.reciprocal(jnp.sum(p, axis=-1, keepdims=True), approx=True)

    # TODO(synk): nn.Dropout(0.2) is identity in eval mode; training-mode dropout omitted.
    # TODO(synk): for sequences far beyond BLOCK_SIZE, switch to a KV-tiled flash-style loop
    #             that skips fully-masked upper-triangular tiles; unnecessary for T <= 256.

    out = jnp.einsum('bqk,bkh->bqh', p.astype(jnp.bfloat16), v,
                     preferred_element_type=jnp.float32)      # (Bb, T, H)
    o_ref[...] = out.astype(o_ref.dtype)


def head_forward(x, w_key, w_query, w_value, *, batch_block=None):
    """x: (B, T, C); w_*: (C, head_size) (already transposed from the PyTorch layout)."""
    B, T, C = x.shape
    H = w_key.shape[1]
    assert C == N_EMBED and T <= BLOCK_SIZE
    assert T % 8 == 0, "sequence length should be sublane-aligned"

    if batch_block is None:
        # Amortize the ~0.35us per-step overhead while keeping >=2 grid steps so the
        # 'parallel' axis can still shard across v7x's 2 TensorCores.
        batch_block = max(1, B // 2)
    assert B % batch_block == 0
    nb = B // batch_block

    # One-time parameter prep: fuse the three projection weights, feed the MXU bf16 operands.
    w_fused = jnp.concatenate([w_key, w_query, w_value], axis=1).astype(jnp.bfloat16)

    return pl.pallas_call(
        _head_kernel,
        out_shape=jax.ShapeDtypeStruct((B, T, H), x.dtype),
        grid_spec=pltpu.PrefetchScalarGridSpec(
            num_scalar_prefetch=0,
            grid=(nb,),
            in_specs=[
                pl.BlockSpec((batch_block, T, C), lambda b: (b, 0, 0)),
                pl.BlockSpec((C, 3 * H), lambda b: (0, 0)),
            ],
            out_specs=pl.BlockSpec((batch_block, T, H), lambda b: (b, 0, 0)),
        ),
        compiler_params=pltpu.CompilerParams(
            dimension_semantics=("parallel",)),
    )(x, w_fused)


def head_reference(x, w_key, w_query, w_value):
    """Pure-JAX f32 reference mirroring the PyTorch forward (eval mode)."""
    k = x @ w_key
    q = x @ w_query
    v = x @ w_value
    wei = (q @ jnp.swapaxes(k, -1, -2)) * (k.shape[-1] ** -0.5)
    T = x.shape[1]
    mask = jnp.tril(jnp.ones((T, T), dtype=bool))
    wei = jnp.where(mask, wei, -jnp.inf)
    wei = jax.nn.softmax(wei, axis=-1)
    return wei @ v


if __name__ == "__main__":
    B, T, C, HEAD_SIZE = 2, 128, N_EMBED, 64

    key = jax.random.PRNGKey(0)
    kx, kk, kq, kv = jax.random.split(key, 4)

    x = jax.random.normal(kx, (B, T, C), dtype=jnp.float32)
    # nn.Linear(n_embed, head_size, bias=False) weights, stored transposed as (C, H)
    w_key = jax.random.normal(kk, (C, HEAD_SIZE), dtype=jnp.float32) * 0.02
    w_query = jax.random.normal(kq, (C, HEAD_SIZE), dtype=jnp.float32) * 0.02
    w_value = jax.random.normal(kv, (C, HEAD_SIZE), dtype=jnp.float32) * 0.02

    out = head_forward(x, w_key, w_query, w_value)
    out = jax.block_until_ready(out)

    ref = head_reference(x, w_key, w_query, w_value)
    assert out.shape == (B, T, HEAD_SIZE)
    # bf16 operands (f32 accumulation) vs an f32 reference -> relaxed tolerance.
    assert jnp.allclose(out, ref, atol=2e-2, rtol=2e-2), float(jnp.max(jnp.abs(out - ref)))

    print("KERNEL_OK")
</pallas_src>

<mosaic_0001>
module attributes {stable_mosaic.version = 11 : i64} {
  func.func @_head_kernel(%arg0: i32, %arg1: memref<1x128x384xf32, #tpu.memory_space<vmem>>, %arg2: memref<384x192xbf16, #tpu.memory_space<vmem>>, %arg3: memref<1x128x64xf32, #tpu.memory_space<vmem>>) attributes {dimension_semantics = [#tpu.dimension_semantics<parallel>], iteration_bounds = array<i64: 2>, scalar_prefetch = 0 : i64, scratch_operands = 0 : i64, tpu.core_type = #tpu.core_type<tc>, window_params = [{transform_indices = @transform_0, window_bounds = array<i64: 1, 128, 384>}, {pipeline_mode = #tpu.pipeline_mode<synchronous>, transform_indices = @transform_1, window_bounds = array<i64: 384, 192>}, {transform_indices = @transform_2, window_bounds = array<i64: 1, 128, 64>}]} {
    %c0 = arith.constant 0 : index
    %c0_0 = arith.constant 0 : index
    %c0_1 = arith.constant 0 : index
    %0 = vector.load %arg1[%c0, %c0_0, %c0_1] : memref<1x128x384xf32, #tpu.memory_space<vmem>>, vector<1x128x384xf32>
    %1 = arith.truncf %0 : vector<1x128x384xf32> to vector<1x128x384xbf16>
    %c0_2 = arith.constant 0 : index
    %c0_3 = arith.constant 0 : index
    %2 = vector.load %arg2[%c0_2, %c0_3] : memref<384x192xbf16, #tpu.memory_space<vmem>>, vector<384x192xbf16>
    %3 = vector.shape_cast %1 : vector<1x128x384xbf16> to vector<128x384xbf16>
    %cst = arith.constant dense<0.000000e+00> : vector<128x192xf32>
    %4 = tpu.matmul %3, %2, %cst {dimension_numbers = #tpu.dot_dimension_numbers<[1], [0], [0], [1], [0, 0, 1, 1], [], []>} : vector<128x384xbf16>, vector<384x192xbf16>, vector<128x192xf32> -> vector<128x192xf32>
    %5 = vector.shape_cast %4 : vector<128x192xf32> to vector<1x128x192xf32>
    %6 = vector.extract_strided_slice %5 {offsets = [0, 0, 0], sizes = [1, 128, 64], strides = [1, 1, 1]} : vector<1x128x192xf32> to vector<1x128x64xf32>
    %7 = arith.truncf %6 : vector<1x128x64xf32> to vector<1x128x64xbf16>
    %8 = vector.extract_strided_slice %5 {offsets = [0, 0, 64], sizes = [1, 128, 64], strides = [1, 1, 1]} : vector<1x128x192xf32> to vector<1x128x64xf32>
    %cst_4 = arith.constant 1.250000e-01 : f32
    %9 = vector.broadcast %cst_4 : f32 to vector<1x128x64xf32>
    %10 = arith.mulf %8, %9 : vector<1x128x64xf32>
    %11 = arith.truncf %10 : vector<1x128x64xf32> to vector<1x128x64xbf16>
    %12 = vector.extract_strided_slice %5 {offsets = [0, 0, 128], sizes = [1, 128, 64], strides = [1, 1, 1]} : vector<1x128x192xf32> to vector<1x128x64xf32>
    %13 = arith.truncf %12 : vector<1x128x64xf32> to vector<1x128x64xbf16>
    "tpu.trace_start"() <{level = 10 : i32, message = "bqh,bkh->bqk"}> : () -> ()
    %cst_5 = arith.constant dense<0.000000e+00> : vector<1x128x128xf32>
    %14 = tpu.matmul %11, %7, %cst_5 {dimension_numbers = #tpu.dot_dimension_numbers<[2], [2], [1], [1], [0, 0, 0, 1, 1, 1], [0], [0]>} : vector<1x128x64xbf16>, vector<1x128x64xbf16>, vector<1x128x128xf32> -> vector<1x128x128xf32>
    "tpu.trace_stop"() : () -> ()
    %15 = tpu.iota {dimensions = array<i32: 1>} : vector<1x128x128xi32>
    %16 = tpu.iota {dimensions = array<i32: 2>} : vector<1x128x128xi32>
    %17 = arith.cmpi sle, %16, %15 : vector<1x128x128xi32>
    %cst_6 = arith.constant 0xFF800000 : f32
    %18 = vector.broadcast %cst_6 : f32 to vector<1x128x128xf32>
    %19 = arith.select %17, %14, %18 : vector<1x128x128xi1>, vector<1x128x128xf32>
    %cst_7 = arith.constant dense<0xFF800000> : vector<1x128xf32>
    %20 = vector.multi_reduction <maximumf>, %19, %cst_7 [2] : vector<1x128x128xf32> to vector<1x128xf32>
    %21 = vector.shape_cast %20 : vector<1x128xf32> to vector<1x128x1xf32>
    %22 = vector.broadcast %21 : vector<1x128x1xf32> to vector<1x128x128xf32>
    %23 = arith.subf %19, %22 : vector<1x128x128xf32>
    %24 = math.exp %23 : vector<1x128x128xf32>
    %cst_8 = arith.constant dense<0.000000e+00> : vector<1x128xf32>
    %25 = vector.multi_reduction <add>, %24, %cst_8 [2] : vector<1x128x128xf32> to vector<1x128xf32>
    %26 = vector.shape_cast %25 : vector<1x128xf32> to vector<1x128x1xf32>
    %27 = tpu.reciprocal %26 {approx = true} : vector<1x128x1xf32> -> vector<1x128x1xf32>
    %28 = vector.broadcast %27 : vector<1x128x1xf32> to vector<1x128x128xf32>
    %29 = arith.mulf %24, %28 : vector<1x128x128xf32>
    %30 = arith.truncf %29 : vector<1x128x128xf32> to vector<1x128x128xbf16>
    "tpu.trace_start"() <{level = 10 : i32, message = "bqk,bkh->bqh"}> : () -> ()
    %cst_9 = arith.constant dense<0.000000e+00> : vector<1x128x64xf32>
    %31 = tpu.matmul %30, %13, %cst_9 {dimension_numbers = #tpu.dot_dimension_numbers<[2], [1], [1], [2], [0, 0, 0, 1, 1, 2], [0], [0]>} : vector<1x128x128xbf16>, vector<1x128x64xbf16>, vector<1x128x64xf32> -> vector<1x128x64xf32>
    "tpu.trace_stop"() : () -> ()
    %c0_10 = arith.constant 0 : index
    %c0_11 = arith.constant 0 : index
    %c0_12 = arith.constant 0 : index
    %32 = vector.load %arg3[%c0_10, %c0_11, %c0_12] : memref<1x128x64xf32, #tpu.memory_space<vmem>>, vector<1x128x64xf32>
    tpu.vector_store %arg3[%c0_10, %c0_11, %c0_12], %31 {strides = array<i32>} : memref<1x128x64xf32, #tpu.memory_space<vmem>>, vector<1x128x64xf32>,
    return
  }
  func.func @transform_0(%arg0: i32) -> (i32, i32, i32) {
    %c0_i32 = arith.constant 0 : i32
    %c0_i32_0 = arith.constant 0 : i32
    %c0_i32_1 = arith.constant 0 : i32
    return %arg0, %c0_i32, %c0_i32_0 : i32, i32, i32
  }
  func.func @transform_1(%arg0: i32) -> (i32, i32) {
    %c0_i32 = arith.constant 0 : i32
    %c0_i32_0 = arith.constant 0 : i32
    %c0_i32_1 = arith.constant 0 : i32
    return %c0_i32, %c0_i32_0 : i32, i32
  }
  func.func @transform_2(%arg0: i32) -> (i32, i32, i32) {
    %c0_i32 = arith.constant 0 : i32
    %c0_i32_0 = arith.constant 0 : i32
    %c0_i32_1 = arith.constant 0 : i32
    return %arg0, %c0_i32, %c0_i32_0 : i32, i32, i32
  }
}

</mosaic_0001>

<bundles_post_ra>
// kernel: tpu_custom_call.1
= control target key start
LH: loop header
LB: loop body
LE: loop exit
PB: predicated region body
PF: predicated region fallthrough
CT: control target
= control target key end

     0   :  { %7 = vsyncpa [#allocation3], 0  ;;  %s2421_s0 = inlined_call_operand.hbm [shape: f32[2,128,384], index: 0, kind: input, shape index: {}]   ;;  %s2422_s1 = inlined_call_operand.vmem [shape: bf16[384,192], index: 1, kind: input, shape index: {}]   ;;  %s2423_s2 = inlined_call_operand.vmem [shape: f32[2,128,64], index: 2, kind: output, shape index: {}]  }
   0x1   :  { %9 = vsyncpa [#allocation3 + $0x1], 0  ;;  %s1830_s9 = smov 0   ;;  %s1832_s10 = smov 0  }
   0x2   :  { %s1834_s11 = smov 0   ;;  %s1836_s12 = smov 0  }
   0x3 LB: > { %s1849_s13 = sadd.s32 4294967295, %s1808_s12   ;;  %s1852_s14 = sadd.s32 1, %s1808_s12   ;;  %s1808_s12 = sphi %s1836_s12, %s2430_s12   ;;  %s1804_s11 = sphi %s1834_s11, %s2429_s11   ;;  %s1800_s10 = sphi %s1832_s10, %s2428_s10   ;;  %s1796_s9 = sphi %s1830_s9, %s2427_s9  }
   0x4   : > { %s19_s15 = ssub.s32 %s1808_s12, %s1852_s14  ;;  %s22_s16 = sadd.s32 1, %s1804_s11 }
   0x5   : > { %p20_p0 = scmp.eq.s32.totalorder %s19_s15, 0  ;;  %p29_p1 = scmp.ne.s32.totalorder %s1804_s11, %s1800_s10 }
   0x6   : > { %p30_p2 = scmp.eq.s32.totalorder %s1808_s12, 0  ;;  %p35_p3 = scmp.ne.s32.totalorder %s1800_s10, %s1796_s9 }
   0x7   : > { %s1862_s17 = scalar_select %p20_p0, %s1804_s11, %s22_s16  }
   0x8   : > { %p31_p4 = por %p30_p2, %p29_p1  ;;  %p36_p5 = scmp.eq.s32.totalorder %s1849_s13, 0 }
   0x9   : > { %p1571_p6 = scmp.lt.s32.totalorder %s1808_s12, 2  ;;  %s109_s19 = sand.u32 1, %s1804_s11  }
   0xa   : > { %p1866_p7 = por %p36_p5, %p35_p3  ;;  %s1562_s20 = smul.u32 384, %s109_s19 }
   0xb   : > { %s1563_s21 = smul.u32 6144, %s1808_s12  ;;  %p1872_p8 = pnand %p1571_p6, %p31_p4 }
   0xc   : > { %s113_s26 = scalar_lea.vmem [#allocation2], %s1562_s20  ;;  %s1884_s28 = scalar_lea.sflag [#allocation3], %s109_s19 }
   0xd   : > { %s1879_s25 = scalar_lea.hbm %s2421_s0, %s1563_s21  ;;  %s120_s27 = sshll.u32 %s113_s26, 4  ;;  %s1881_s27 = int_to_ptr.vmem [resolvable:$true] %s120_s27 }
   0xe   : > { %s1744_s29 = scalar_lea.hbm %s1879_s25, 6144  ;;  %p1746_p11 = pneg %p1872_p8 }
   0xf   : > { %p1745_p10 = scmp.ne.s32.totalorder %s1879_s25, %s1744_s29  ;;  %s1749_s4 = scalar_lea.hbm %s2421_s0, 12288 }
  0x10   : > { %p1750_p0 = scmp.lt.u32.totalorder %s1879_s25, %s2421_s0  ;;  %p1751_p1 = scmp.lt.u32.totalorder %s1749_s4, %s1744_s29 }
  0x11   : > { %p1747_p12 = pnand %p1746_p11, %p1745_p10  ;;  %p1753_p3 = scmp.lt.u32.totalorder %s1744_s29, %s1879_s25 }
  0x12   : > { %p1752_p2 = por %p1751_p1, %p1750_p0 }
  0x13   : > { %p1748_p13 = pneg %p1747_p12 }
  0x14   : > { %p1754_p4 = por %p1753_p3, %p1752_p2 }
  0x16   : > { %p1755_p5 = pnand %p1754_p4, %p1748_p13 }
  0x18   : > { %1758 = shalt.err (!%p1755_p5)
}
  0x19   : > { %s1759_s7 = scalar_lea.vmem %s1881_s27, 6144  ;;  %s1810_s8 = smov [#allocation2]  }
  0x1a   : > { %p1760_p6 = scmp.ne.s32.totalorder %s1881_s27, %s1759_s7  ;;  %s1764_s9 = sshll.u32 %s1810_s8, 4  ;;  %s1765_s9 = int_to_ptr.vmem [resolvable:$false] %s1764_s9 }
  0x1b   : > { %s1766_s15 = scalar_lea.vmem %s1765_s9, 12288  ;;  %p1767_p9 = scmp.lt.s32.totalorder %s1881_s27, %s1765_s9 }
  0x1c   : > { %p1762_p10 = pnand %p1760_p6, %p1746_p11  ;;  %p1768_p0 = scmp.lt.s32.totalorder %s1766_s15, %s1759_s7 }
  0x1e   : > { %p1763_p12 = pneg %p1762_p10  ;;  %p1769_p1 = por %p1768_p0, %p1767_p9 }
  0x20   : > { %p1770_p2 = pnand %p1769_p1, %p1763_p12 }
  0x22   : > { %1773 = shalt.err (!%p1770_p2)
}
  0x23   : > { %s1811_s16 = smov 384   ;;  %s1812_s19 = smov 24  }
  0x24   : > { %1570 = dma.hbm_to_vmem [thread:$0]  (!%p1872_p8), %s1879_s25, 6144, %s1881_s27, %s1884_s28, %s1811_s16, %s1811_s16, %s1812_s19  }
  0x25   : > { %p128_p11 = scmp.lt.s32.totalorder %s1808_s12, 3  ;;  %p2426_p13 = scmp.ge.s32.totalorder %s1808_s12, 1 }
  0x27   : > { %p129_p3 = pnand %p2426_p13, %p128_p11 }
  0x28   : > { %s134_s20 = sand.u32 (!%p129_p3), 1, %s1800_s10  }
  0x29   : > { %132 = sbr.rel (%p129_p3) target bundleno = 1255 (0x4e7), region = 28  ;;  %s135_s23 = scalar_lea.sflag (!%p129_p3), [#allocation3], %s134_s20 }
  0x2a   : > { %s1564_s21 = smul.u32 (!%p129_p3), 384, %s134_s20 }
  0x2c   : > { %s1916_s24 = scalar_lea.vmem (!%p129_p3), [#allocation2], %s1564_s21 }
  0x30   : > { %1791 = dma.done.wait (%p1866_p7), %s135_s23, 6144  }
  0x31   : > { %1793 = vsyncadd (%p1866_p7), %s135_s23, 4294961152  ;;  %v1813_v0 = vmov 0   ;;  %v1608_v1 = vld [vmem:[%s2422_s1 + $0x4] ss:$8 sps:$4 sm:$0xff]   ;;  %v1610_v2 = vld [vmem:[%s2422_s1] ss:$8 sps:$4 sm:$0xff]  }
  0x32   : > { %670 = vmatprep.mubr.bf16.mxu1 %v1813_v0  ;;  %525 = vmatprep.subr.bf16.mxu0 %v1608_v1  ;;  %v1611_v3 = vld [vmem:[%s2422_s1 + $0x14] ss:$8 sps:$4 sm:$0xff]   ;;  %v1613_v4 = vld [vmem:[%s2422_s1 + $0x10] ss:$8 sps:$4 sm:$0xff]   ;;  %v1614_v5 = vld [vmem:[%s2422_s1 + $0x24] ss:$8 sps:$4 sm:$0xff]  }
  0x33   : > { %526 = vmatpush1.bf16.msra.mxu0 %v1610_v2  ;;  %v1616_v6 = vld [vmem:[%s2422_s1 + $0x20] ss:$8 sps:$4 sm:$0xff]   ;;  %v1617_v7 = vld [vmem:[%s2422_s1 + $0x34] ss:$8 sps:$4 sm:$0xff]   ;;  %v1619_v8 = vld [vmem:[%s2422_s1 + $0x30] ss:$8 sps:$4 sm:$0xff]  }
  0x34   : > { %527 = vmatprep.subr.bf16.mxu0 %v1611_v3  ;;  %v1632_v9 = vld [vmem:[%s2422_s1 + $0x104] ss:$8 sps:$4 sm:$0xff]   ;;  %v1634_v10 = vld [vmem:[%s2422_s1 + $0x100] ss:$8 sps:$4 sm:$0xff]   ;;  %v1638_v12 = vld [vmem:[%s2422_s1 + $0x114] ss:$8 sps:$4 sm:$0xff]  }
  0x35   : > { %v1620_v11 = vld [vmem:[%s2422_s1 + $0x44] ss:$8 sps:$4 sm:$0xff]   ;;  %638 = vmatprep.subr.bf16.mxu1 %v1632_v9  ;;  %v1640_v13 = vld [vmem:[%s2422_s1 + $0x110] ss:$8 sps:$4 sm:$0xff]   ;;  %v1622_v14 = vld [vmem:[%s2422_s1 + $0x40] ss:$8 sps:$4 sm:$0xff]  }
  0x36   : > { %639 = vmatpush1.bf16.msra.mxu1 %v1634_v10  ;;  %v1623_v15 = vld [vmem:[%s2422_s1 + $0x54] ss:$8 sps:$4 sm:$0xff]   ;;  %v1644_v16 = vld [vmem:[%s2422_s1 + $0x124] ss:$8 sps:$4 sm:$0xff]   ;;  %v1646_v17 = vld [vmem:[%s2422_s1 + $0x120] ss:$8 sps:$4 sm:$0xff]  }
  0x37   : > { %528 = vmatpush1.bf16.msra.mxu0 %v1613_v4  ;;  %640 = vmatprep.subr.bf16.mxu1 %v1638_v12  ;;  %v1625_v18 = vld [vmem:[%s2422_s1 + $0x50] ss:$8 sps:$4 sm:$0xff]   ;;  %v1650_v19 = vld [vmem:[%s2422_s1 + $0x134] ss:$8 sps:$4 sm:$0xff]   ;;  %v1626_v20 = vld [vmem:[%s2422_s1 + $0x64] ss:$8 sps:$4 sm:$0xff]  }
  0x38   : > { %529 = vmatprep.subr.bf16.mxu0 %v1614_v5  ;;  %v1652_v21 = vld [vmem:[%s2422_s1 + $0x130] ss:$8 sps:$4 sm:$0xff]   ;;  %v1628_v22 = vld [vmem:[%s2422_s1 + $0x60] ss:$8 sps:$4 sm:$0xff]   ;;  %v1656_v23 = vld [vmem:[%s2422_s1 + $0x144] ss:$8 sps:$4 sm:$0xff]  }
  0x39   : > { %v1629_v24 = vld [vmem:[%s2422_s1 + $0x74] ss:$8 sps:$4 sm:$0xff]   ;;  %v1658_v25 = vld [vmem:[%s2422_s1 + $0x140] ss:$8 sps:$4 sm:$0xff]   ;;  %v1631_v26 = vld [vmem:[%s2422_s1 + $0x70] ss:$8 sps:$4 sm:$0xff]  }
  0x3a   : > { %641 = vmatpush1.bf16.msra.mxu1 %v1640_v13  ;;  %v1662_v27 = vld [vmem:[%s2422_s1 + $0x154] ss:$8 sps:$4 sm:$0xff]   ;;  %v1635_v28 = vld [vmem:[%s2422_s1 + $0x84] ss:$8 sps:$4 sm:$0xff]   ;;  %v1664_v29 = vld [vmem:[%s2422_s1 + $0x150] ss:$8 sps:$4 sm:$0xff]  }
  0x3b   : > { %530 = vmatpush1.bf16.msra.mxu0 %v1616_v6  ;;  %642 = vmatprep.subr.bf16.mxu1 %v1644_v16  ;;  %v1637_v30 = vld [vmem:[%s2422_s1 + $0x80] ss:$8 sps:$4 sm:$0xff]   ;;  %v1668_v31 = vld [vmem:[%s2422_s1 + $0x164] ss:$8 sps:$4 sm:$0xff]   ;;  %v1641_v32 = vld [vmem:[%s2422_s1 + $0x94] ss:$8 sps:$4 sm:$0xff]  }
  0x3c   : > { %531 = vmatprep.subr.bf16.mxu0 %v1617_v7  ;;  %v166_v33 = vld [vmem:[%s1916_s24 + $0x8] sm:$0xff]  ;;  %v169_v34 = vld [vmem:[%s1916_s24 + $0x20] sm:$0xff]  ;;  %v1643_v37 = vld [vmem:[%s2422_s1 + $0x90] ss:$8 sps:$4 sm:$0xff]   ;;  %vm815_vm0 = vcmask 523264   ;;  %p159_p7 = scmp.lt.s32.totalorder %s1849_s13, 1 }
  0x3d   : > { %v1670_v35 = vld [vmem:[%s2422_s1 + $0x160] ss:$8 sps:$4 sm:$0xff]   ;;  %v214_v36 = vpack.c.bf16 %v169_v34, %v166_v33  ;;  %v1674_v38 = vld [vmem:[%s2422_s1 + $0x174] ss:$8 sps:$4 sm:$0xff]   ;;  %v1647_v39 = vld [vmem:[%s2422_s1 + $0xa4] ss:$8 sps:$4 sm:$0xff]  }
  0x3e   : > { %643 = vmatpush1.bf16.msra.mxu1 %v1646_v17  ;;  %v1676_v40 = vld [vmem:[%s2422_s1 + $0x170] ss:$8 sps:$4 sm:$0xff]   ;;  %v170_v42 = vld [vmem:[%s1916_s24 + $0x28] sm:$0xff]  ;;  %v1653_v44 = vld [vmem:[%s2422_s1 + $0xb4] ss:$8 sps:$4 sm:$0xff]   ;;  %s2432_s13 = smov (!%p159_p7, %s1849_s13), 1 }
  0x3f   : > { %532 = vmatpush1.bf16.msra.mxu0 %v1619_v8  ;;  %644 = vmatprep.subr.bf16.mxu1 %v1650_v19  ;;  %v167_v41 = vld [vmem:[%s1916_s24 + $0x10] sm:$0xff]  ;;  %v1649_v43 = vld [vmem:[%s2422_s1 + $0xa0] ss:$8 sps:$4 sm:$0xff]   ;;  %v1659_v47 = vld [vmem:[%s2422_s1 + $0xc4] ss:$8 sps:$4 sm:$0xff]   ;;  %s1409_s30 = sshll.u32 %s2432_s13, 7 }
  0x40   : > { %533 = vmatprep.subr.bf16.mxu0 %v1620_v11  ;;  %557 = vmatprep.mubr.bf16.mxu0 %v214_v36  ;;  %v215_v45 = vpack.c.bf16 %v170_v42, %v167_v41  ;;  %v1655_v46 = vld [vmem:[%s2422_s1 + $0xb0] ss:$8 sps:$4 sm:$0xff]   ;;  %v173_v48 = vld [vmem:[%s1916_s24 + $0x40] sm:$0xff]  ;;  %v1665_v51 = vld [vmem:[%s2422_s1 + $0xd4] ss:$8 sps:$4 sm:$0xff]   ;;  %s2374_s5 = scalar_lea.vmem %s2423_s2, %s1409_s30 }
  0x41   : > { %v176_v49 = vld [vmem:[%s1916_s24 + $0x58] sm:$0xff]  ;;  %v1661_v50 = vld [vmem:[%s2422_s1 + $0xc0] ss:$8 sps:$4 sm:$0xff]   ;;  %v1671_v54 = vld [vmem:[%s2422_s1 + $0xe4] ss:$8 sps:$4 sm:$0xff]  }
  0x42   : > { %645 = vmatpush1.bf16.msra.mxu1 %v1652_v21  ;;  %v218_v52 = vpack.c.bf16 %v176_v49, %v173_v48  ;;  %v1667_v53 = vld [vmem:[%s2422_s1 + $0xd0] ss:$8 sps:$4 sm:$0xff]   ;;  %v182_v56 = vld [vmem:[%s1916_s24 + $0x88] sm:$0xff]  ;;  %v1677_v58 = vld [vmem:[%s2422_s1 + $0xf4] ss:$8 sps:$4 sm:$0xff]  }
  0x43   : > { %534 = vmatpush1.bf16.msra.mxu0 %v1622_v14  ;;  %646 = vmatprep.subr.bf16.mxu1 %v1656_v23  ;;  %v179_v55 = vld [vmem:[%s1916_s24 + $0x70] sm:$0xff]  ;;  %v1673_v57 = vld [vmem:[%s2422_s1 + $0xe0] ss:$8 sps:$4 sm:$0xff]   ;;  %v168_v62 = vld [vmem:[%s1916_s24 + $0x18] sm:$0xff] }
  0x44   : > { %535 = vmatprep.subr.bf16.mxu0 %v1623_v15  ;;  %v221_v59 = vpack.c.bf16 %v182_v56, %v179_v55  ;;  %v1679_v60 = vld [vmem:[%s2422_s1 + $0xf0] ss:$8 sps:$4 sm:$0xff]   ;;  %v165_v61 = vld [vmem:[%s1916_s24] sm:$0xff]  ;;  %v174_v8 = vld [vmem:[%s1916_s24 + $0x48] sm:$0xff] }
  0x45   : > { %v172_v63 = vld [vmem:[%s1916_s24 + $0x38] sm:$0xff]  ;;  %v175_v1 = vld [vmem:[%s1916_s24 + $0x50] sm:$0xff]  ;;  %v213_v2 = vpack.c.bf16 %v168_v62, %v165_v61  ;;  %v185_v3 = vld [vmem:[%s1916_s24 + $0xa0] sm:$0xff] }
  0x46   : > { %647 = vmatpush1.bf16.msra.mxu1 %v1658_v25  ;;  %v188_v4 = vld [vmem:[%s1916_s24 + $0xb8] sm:$0xff]  ;;  %v217_v5 = vpack.c.bf16 %v175_v1, %v172_v63  ;;  %v171_v7 = vld [vmem:[%s1916_s24 + $0x30] sm:$0xff]  ;;  %v178_v9 = vld [vmem:[%s1916_s24 + $0x68] sm:$0xff] }
  0x47   : > { %536 = vmatpush1.bf16.msra.mxu0 %v1625_v18  ;;  %648 = vmatprep.subr.bf16.mxu1 %v1662_v27  ;;  %v224_v6 = vpack.c.bf16 %v188_v4, %v185_v3  ;;  %v181_v10 = vld [vmem:[%s1916_s24 + $0x80] sm:$0xff]  ;;  %v216_v11 = vpack.c.bf16 %v174_v8, %v171_v7  ;;  %v191_v12 = vld [vmem:[%s1916_s24 + $0xd0] sm:$0xff]  ;;  %v194_v13 = vld [vmem:[%s1916_s24 + $0xe8] sm:$0xff] }
  0x48   : > { %537 = vmatprep.subr.bf16.mxu0 %v1626_v20  ;;  %v220_v14 = vpack.c.bf16 %v181_v10, %v178_v9  ;;  %v227_v15 = vpack.c.bf16 %v194_v13, %v191_v12  ;;  %v177_v16 = vld [vmem:[%s1916_s24 + $0x60] sm:$0xff]  ;;  %v180_v17 = vld [vmem:[%s1916_s24 + $0x78] sm:$0xff]  ;;  %v187_v19 = vld [vmem:[%s1916_s24 + $0xb0] sm:$0xff] }
  0x49   : > { %v184_v18 = vld [vmem:[%s1916_s24 + $0x98] sm:$0xff]  ;;  %v219_v20 = vpack.c.bf16 %v180_v17, %v177_v16  ;;  %v197_v21 = vld [vmem:[%s1916_s24 + $0x100] sm:$0xff]  ;;  %v183_v25 = vld [vmem:[%s1916_s24 + $0x90] sm:$0xff] }
  0x4a   : > { %649 = vmatpush1.bf16.msra.mxu1 %v1664_v29  ;;  %v223_v23 = vpack.c.bf16 %v187_v19, %v184_v18  ;;  %v190_v27 = vld [vmem:[%s1916_s24 + $0xc8] sm:$0xff]  ;;  %v189_v34 = vld [vmem:[%s1916_s24 + $0xc0] sm:$0xff]  ;;  %v196_v36 = vld [vmem:[%s1916_s24 + $0xf8] sm:$0xff] }
  0x4b   : > { %538 = vmatpush1.bf16.msra.mxu0 %v1628_v22  ;;  %650 = vmatprep.subr.bf16.mxu1 %v1668_v31  ;;  %v200_v22 = vld [vmem:[%s1916_s24 + $0x118] sm:$0xff]  ;;  %v206_v31 = vld [vmem:[%s1916_s24 + $0x148] sm:$0xff] }
  0x4c   : > { %539 = vmatprep.subr.bf16.mxu0 %v1629_v24  ;;  %v230_v24 = vpack.c.bf16 %v200_v22, %v197_v21  ;;  %v204_v49 = vld [vmem:[%s1916_s24 + $0x138] sm:$0xff]  ;;  %v210_v55 = vld [vmem:[%s1916_s24 + $0x168] sm:$0xff] }
  0x4e   : > { %651 = vmatpush1.bf16.msra.mxu1 %v1670_v35  ;;  %v192_v35 = vld [vmem:[%s1916_s24 + $0xd8] sm:$0xff] }
  0x4f   : > { %540 = vmatpush1.bf16.msra.mxu0 %v1631_v26  ;;  %652 = vmatprep.subr.bf16.mxu1 %v1674_v38  ;;  %v186_v26 = vld [vmem:[%s1916_s24 + $0xa8] sm:$0xff]  ;;  %v225_v38 = vpack.c.bf16 %v192_v35, %v189_v34 }
  0x50   : > { %541 = vmatprep.subr.bf16.mxu0 %v1635_v28  ;;  %v193_v28 = vld [vmem:[%s1916_s24 + $0xe0] sm:$0xff]  ;;  %v222_v29 = vpack.c.bf16 %v186_v26, %v183_v25 }
  0x52   : > { %653 = vmatpush1.bf16.msra.mxu1 %v1676_v40  ;;  %v212_v40 = vld [vmem:[%s1916_s24 + $0x178] sm:$0xff] }
  0x53   : > { %542 = vmatpush1.bf16.msra.mxu0 %v1637_v30  ;;  %v203_v30 = vld [vmem:[%s1916_s24 + $0x130] sm:$0xff] }
  0x54   : > { %543 = vmatprep.subr.bf16.mxu0 %v1641_v32  ;;  %v226_v32 = vpack.c.bf16 %v193_v28, %v190_v27  ;;  %v233_v33 = vpack.c.bf16 %v206_v31, %v203_v30 }
  0x55   : > { %671 = vmatmul.mubr.bf16.vlgmr.msra.gmra.mrb[0].mxu1 %v215_v45  ;;  %v202_v45 = vld [vmem:[%s1916_s24 + $0x128] sm:$0xff] }
  0x56   : > { %680 = vmatprep.mubr.bf16.mxu1 %v1813_v0 }
  0x57   : > { %544 = vmatpush1.bf16.msra.mxu0 %v1643_v37  ;;  %v199_v37 = vld [vmem:[%s1916_s24 + $0x110] sm:$0xff] }
  0x58   : > { %545 = vmatprep.subr.bf16.mxu0 %v1647_v39  ;;  %v209_v39 = vld [vmem:[%s1916_s24 + $0x160] sm:$0xff]  ;;  %v229_v41 = vpack.c.bf16 %v199_v37, %v196_v36 }
  0x59   : > { %v236_v42 = vpack.c.bf16 %v212_v40, %v209_v39 }
  0x5b   : > { %546 = vmatpush1.bf16.msra.mxu0 %v1649_v43  ;;  %v195_v43 = vld [vmem:[%s1916_s24 + $0xf0] sm:$0xff] }
  0x5c   : > { %547 = vmatprep.subr.bf16.mxu0 %v1653_v44  ;;  %v198_v44 = vld [vmem:[%s1916_s24 + $0x108] sm:$0xff] }
  0x5d   : > { %681 = vmatmul.mubr.bf16.gmra.mrb[4].mxu1 %v218_v52 }
  0x5e   : > { %690 = vmatprep.mubr.bf16.mxu1 %v1813_v0 }
  0x5f   : > { %548 = vmatpush1.bf16.msra.mxu0 %v1655_v46  ;;  %v205_v46 = vld [vmem:[%s1916_s24 + $0x140] sm:$0xff] }
  0x60   : > { %549 = vmatprep.subr.bf16.mxu0 %v1659_v47  ;;  %v228_v47 = vpack.c.bf16 %v198_v44, %v195_v43  ;;  %v232_v48 = vpack.c.bf16 %v205_v46, %v202_v45 }
  0x63   : > { %550 = vmatpush1.bf16.msra.mxu0 %v1661_v50  ;;  %v208_v50 = vld [vmem:[%s1916_s24 + $0x158] sm:$0xff] }
  0x64   : > { %551 = vmatprep.subr.bf16.mxu0 %v1665_v51  ;;  %v211_v51 = vld [vmem:[%s1916_s24 + $0x170] sm:$0xff] }
  0x65   : > { %691 = vmatmul.mubr.bf16.gmra.mrb[8].mxu1 %v221_v59 }
  0x66   : > { %700 = vmatprep.mubr.bf16.mxu1 %v1813_v0 }
  0x67   : > { %552 = vmatpush1.bf16.msra.mxu0 %v1667_v53  ;;  %v235_v53 = vpack.c.bf16 %v211_v51, %v208_v50 }
  0x68   : > { %553 = vmatprep.subr.bf16.mxu0 %v1671_v54  ;;  %v207_v54 = vld [vmem:[%s1916_s24 + $0x150] sm:$0xff] }
  0x69   : > { %v234_v56 = vpack.c.bf16 %v210_v55, %v207_v54 }
  0x6b   : > { %554 = vmatpush1.bf16.msra.mxu0 %v1673_v57 }
  0x6c   : > { %555 = vmatprep.subr.bf16.mxu0 %v1677_v58 }
  0x6d   : > { %701 = vmatmul.mubr.bf16.gmra.mrb[12].mxu1 %v224_v6 }
  0x6e   : > { %710 = vmatprep.mubr.bf16.mxu1 %v1813_v0 }
  0x6f   : > { %556 = vmatpush1.bf16.msra.mxu0 %v1679_v60 }
  0x72   : > { %558 = vmatmul.mubr.bf16.vlgmr.msra.gmra.mrb[0].mxu0 %v213_v2 }
  0x73   : > { %567 = vmatprep.mubr.bf16.mxu0 %v217_v5 }
  0x75   : > { %711 = vmatmul.mubr.bf16.gmra.mrb[16].mxu1 %v227_v15 }
  0x76   : > { %720 = vmatprep.mubr.bf16.mxu1 %v1813_v0 }
  0x7a   : > { %568 = vmatmul.mubr.bf16.gmra.mrb[4].mxu0 %v216_v11 }
  0x7b   : > { %577 = vmatprep.mubr.bf16.mxu0 %v220_v14 }
  0x7d   : > { %721 = vmatmul.mubr.bf16.gmra.mrb[20].mxu1 %v230_v24 }
  0x7e   : > { %730 = vmatprep.mubr.bf16.mxu1 %v1813_v0 }
  0x82   : > { %578 = vmatmul.mubr.bf16.gmra.mrb[8].mxu0 %v219_v20 }
  0x83   : > { %587 = vmatprep.mubr.bf16.mxu0 %v223_v23 }
  0x85   : > { %731 = vmatmul.mubr.bf16.gmra.mrb[24].mxu1 %v233_v33 }
  0x86   : > { %740 = vmatprep.mubr.bf16.mxu1 %v1813_v0  ;;  %v201_v0 = vld [vmem:[%s1916_s24 + $0x120] sm:$0xff]  ;;  %s1814_s24 = smov 64  }
  0x87   : > { %v231_v52 = vpack.c.bf16 %v204_v49, %v201_v0 }
  0x8a   : > { %588 = vmatmul.mubr.bf16.gmra.mrb[12].mxu0 %v222_v29 }
  0x8b   : > { %597 = vmatprep.mubr.bf16.mxu0 %v226_v32 }
  0x8d   : > { %741 = vmatmul.mubr.bf16.gmra.mrb[28].mxu1 %v236_v42 }
  0x92   : > { %598 = vmatmul.mubr.bf16.gmra.mrb[16].mxu0 %v225_v38 }
  0x93   : > { %607 = vmatprep.mubr.bf16.mxu0 %v229_v41 }
  0x9a   : > { %608 = vmatmul.mubr.bf16.gmra.mrb[20].mxu0 %v228_v47 }
  0x9b   : > { %617 = vmatprep.mubr.bf16.mxu0 %v232_v48 }
  0xa2   : > { %618 = vmatmul.mubr.bf16.gmra.mrb[24].mxu0 %v231_v52 }
  0xa3   : > { %627 = vmatprep.mubr.bf16.mxu0 %v235_v53 }
  0xaa   : > { %628 = vmatmul.mubr.bf16.gmra.mrb[28].mxu0 %v234_v56 }
 0x128   : > { %v672_v57 = vpop.f32.mrb[0].mxu1 }
 0x129   : > { %v674_v58 = vpop.f32.mrb[1].mxu1 }
 0x12a   : > { %v676_v59 = vpop.f32.mrb[2].mxu1 }
 0x12b   : > { %v678_v60 = vpop.f32.mrb[3].mxu1 }
 0x130   : > { %v682_v61 = vpop.f32.mrb[4].mxu1 }
 0x131   : > { %v684_v62 = vpop.f32.mrb[5].mxu1 }
 0x132   : > { %v686_v63 = vpop.f32.mrb[6].mxu1 }
 0x133   : > { %v688_v1 = vpop.f32.mrb[7].mxu1 }
 0x138   : > { %v692_v2 = vpop.f32.mrb[8].mxu1 }
 0x139   : > { %v694_v3 = vpop.f32.mrb[9].mxu1 }
 0x13a   : > { %v696_v4 = vpop.f32.mrb[10].mxu1 }
 0x13b   : > { %v698_v5 = vpop.f32.mrb[11].mxu1 }
 0x140   : > { %v2122_v13 = vpop.f32.mrb[12].mxu1 }
 0x141   : > { %v2124_v15 = vpop.f32.mrb[13].mxu1 }
 0x142   : > { %v706_v19 = vpop.f32.mrb[14].mxu1 }
 0x143   : > { %v2128_v21 = vpop.f32.mrb[15].mxu1 }
 0x145   : > { %v559_v6 = vpop.f32.mrb[0].mxu0 }
 0x146   : > { %v673_v7 = vadd.f32 %v672_v57, %v559_v6  ;;  %v561_v8 = vpop.f32.mrb[1].mxu0 }
 0x147   : > { %v675_v9 = vadd.f32 %v674_v58, %v561_v8  ;;  %v563_v10 = vpop.f32.mrb[2].mxu0 }
 0x148   : > { %v677_v11 = vadd.f32 %v676_v59, %v563_v10  ;;  %v565_v12 = vpop.f32.mrb[3].mxu0  ;;  %v759_v16 = vmul.f32 0.125, %v673_v7  ;;  %v712_v31 = vpop.f32.mrb[16].mxu1 }
 0x149   : > { %v679_v14 = vadd.f32 %v678_v60, %v565_v12  ;;  %v2135_v33 = vpop.f32.mrb[17].mxu1 }
 0x14a   : > { %v751_v17 = vpack.c.bf16 %v677_v11, %v673_v7  ;;  %v760_v18 = vmul.f32 0.125, %v677_v11  ;;  %v716_v37 = vpop.f32.mrb[18].mxu1 }
 0x14b   : > { %v2126_v20 = vpack.c.bf16 %v679_v14, %v675_v9  ;;  %v718_v39 = vpop.f32.mrb[19].mxu1 }
 0x14c   : > { %1554 = vmatprep.subr.msk.bf16.mxu1 %vm815_vm0, %v751_v17  ;;  %v841_v22 = vsel %vm815_vm0, %v751_v17, 0  ;;  %v775_v23 = vpack.c.bf16 %v760_v18, %v759_v16 }
 0x14d   : > { %v569_v24 = vpop.f32.mrb[4].mxu0  ;;  %1443 = vmatpush3.bf16.xpose.msra.mxu1 %v841_v22  ;;  %1474 = vmatprep.subr.bf16.mxu0 %v2126_v20 }
 0x14e   : > { %v683_v25 = vadd.f32 %v682_v61, %v569_v24  ;;  %799 = vrot.lane.b32.xlu0 %v775_v23, %s1814_s24  ;;  %v571_v26 = vpop.f32.mrb[5].mxu0  ;;  %1475 = vmatpush3.bf16.msra.mxu0 %v2126_v20 }
 0x14f   : > { %v685_v27 = vadd.f32 %v684_v62, %v571_v26  ;;  %v573_v28 = vpop.f32.mrb[6].mxu0 }
 0x150   : > { %v687_v29 = vadd.f32 %v686_v63, %v573_v28  ;;  %v575_v30 = vpop.f32.mrb[7].mxu0  ;;  %v761_v34 = vmul.f32 0.125, %v683_v25  ;;  %v722_v0 = vpop.f32.mrb[20].mxu1 }
 0x151   : > { %v689_v32 = vadd.f32 %v688_v1, %v575_v30  ;;  %v2144_v50 = vpop.f32.mrb[21].mxu1 }
 0x152   : > { %v752_v35 = vpack.c.bf16 %v687_v29, %v683_v25  ;;  %v762_v36 = vmul.f32 0.125, %v687_v29  ;;  %v726_v54 = vpop.f32.mrb[22].mxu1 }
 0x153   : > { %v2137_v38 = vpack.c.bf16 %v689_v32, %v685_v27  ;;  %v728_v56 = vpop.f32.mrb[23].mxu1 }
 0x154   : > { %1555 = vmatprep.subr.msk.bf16.mxu1 %vm815_vm0, %v752_v35  ;;  %v844_v40 = vsel %vm815_vm0, %v752_v35, 0  ;;  %v776_v41 = vpack.c.bf16 %v762_v36, %v761_v34 }
 0x155   : > { %v579_v42 = vpop.f32.mrb[8].mxu0  ;;  %1445 = vmatpush3.bf16.xpose.msra.mxu1 %v844_v40  ;;  %1476 = vmatprep.subr.bf16.mxu0 %v2137_v38 }
 0x156   : > { %v693_v43 = vadd.f32 %v692_v2, %v579_v42  ;;  %801 = vrot.lane.b32.xlu0 %v776_v41, %s1814_s24  ;;  %v581_v44 = vpop.f32.mrb[9].mxu0  ;;  %1477 = vmatpush3.bf16.msra.mxu0 %v2137_v38 }
 0x157   : > { %v695_v45 = vadd.f32 %v694_v3, %v581_v44  ;;  %v583_v46 = vpop.f32.mrb[10].mxu0 }
 0x158   : > { %v697_v47 = vadd.f32 %v696_v4, %v583_v46  ;;  %v585_v48 = vpop.f32.mrb[11].mxu0  ;;  %v763_v51 = vmul.f32 0.125, %v693_v43  ;;  %v732_v3 = vpop.f32.mrb[24].mxu1 }
 0x159   : > { %v699_v49 = vadd.f32 %v698_v5, %v585_v48  ;;  %v734_v5 = vpop.f32.mrb[25].mxu1 }
 0x15a   : > { %v753_v52 = vpack.c.bf16 %v697_v47, %v693_v43  ;;  %v764_v53 = vmul.f32 0.125, %v697_v47  ;;  %v736_v9 = vpop.f32.mrb[26].mxu1 }
 0x15b   : > { %v2146_v55 = vpack.c.bf16 %v699_v49, %v695_v45  ;;  %v738_v11 = vpop.f32.mrb[27].mxu1 }
 0x15c   : > { %1556 = vmatprep.subr.msk.bf16.mxu1 %vm815_vm0, %v753_v52  ;;  %v847_v57 = vsel %vm815_vm0, %v753_v52, 0  ;;  %v777_v58 = vpack.c.bf16 %v764_v53, %v763_v51 }
 0x15d   : > { %v589_v59 = vpop.f32.mrb[12].mxu0  ;;  %1447 = vmatpush3.bf16.xpose.msra.mxu1 %v847_v57  ;;  %1478 = vmatprep.subr.bf16.mxu0 %v2146_v55 }
 0x15e   : > { %v703_v60 = vadd.f32 %v2122_v13, %v589_v59  ;;  %803 = vrot.lane.b32.xlu1 %v777_v58, %s1814_s24  ;;  %v591_v61 = vpop.f32.mrb[13].mxu0  ;;  %1479 = vmatpush3.bf16.msra.mxu0 %v2146_v55 }
 0x15f   : > { %v705_v62 = vadd.f32 %v2124_v15, %v591_v61  ;;  %v593_v63 = vpop.f32.mrb[14].mxu0 }
 0x160   : > { %v707_v1 = vadd.f32 %v706_v19, %v593_v63  ;;  %v595_v2 = vpop.f32.mrb[15].mxu0  ;;  %v765_v6 = vmul.f32 0.125, %v703_v60  ;;  %v742_v22 = vpop.f32.mrb[28].mxu1 }
 0x161   : > { %v709_v4 = vadd.f32 %v2128_v21, %v595_v2  ;;  %v744_v24 = vpop.f32.mrb[29].mxu1 }
 0x162   : > { %v754_v7 = vpack.c.bf16 %v707_v1, %v703_v60  ;;  %v766_v8 = vmul.f32 0.125, %v707_v1  ;;  %v746_v28 = vpop.f32.mrb[30].mxu1 }
 0x163   : > { %v2156_v10 = vpack.c.bf16 %v709_v4, %v705_v62  ;;  %v748_v30 = vpop.f32.mrb[31].mxu1 }
 0x164   : > { %1557 = vmatprep.subr.msk.bf16.mxu1 %vm815_vm0, %v754_v7  ;;  %v850_v12 = vsel %vm815_vm0, %v754_v7, 0  ;;  %v778_v13 = vpack.c.bf16 %v766_v8, %v765_v6 }
 0x165   : > { %v599_v14 = vpop.f32.mrb[16].mxu0  ;;  %1449 = vmatpush3.bf16.xpose.msra.mxu1 %v850_v12  ;;  %1480 = vmatprep.subr.bf16.mxu0 %v2156_v10 }
 0x166   : > { %v713_v15 = vadd.f32 %v712_v31, %v599_v14  ;;  %805 = vrot.lane.b32.xlu1 %v778_v13, %s1814_s24  ;;  %v601_v16 = vpop.f32.mrb[17].mxu0  ;;  %1481 = vmatpush3.bf16.msra.mxu0 %v2156_v10 }
 0x167   : > { %v715_v17 = vadd.f32 %v2135_v33, %v601_v16  ;;  %v603_v18 = vpop.f32.mrb[18].mxu0 }
 0x168   : > { %v717_v19 = vadd.f32 %v716_v37, %v603_v18  ;;  %v605_v21 = vpop.f32.mrb[19].mxu0  ;;  %v767_v25 = vmul.f32 0.125, %v713_v15  ;;  %v961_v18 = vlaneseq }
 0x169   : > { %v719_v23 = vadd.f32 %v718_v39, %v605_v21 }
 0x16a   : > { %v755_v26 = vpack.c.bf16 %v717_v19, %v713_v15  ;;  %v768_v27 = vmul.f32 0.125, %v717_v19  ;;  %v2205_v19 = vshrl.u32 %v961_v18, 7 }
 0x16b   : > { %v2164_v29 = vpack.c.bf16 %v719_v23, %v715_v17 }
 0x16c   : > { %1558 = vmatprep.subr.msk.bf16.mxu1 %vm815_vm0, %v755_v26  ;;  %v853_v31 = vsel %vm815_vm0, %v755_v26, 0  ;;  %v779_v32 = vpack.c.bf16 %v768_v27, %v767_v25  ;;  %v964_v21 = vadd.s32 16, %v2205_v19  ;;  %v963_v23 = vadd.s32 8, %v2205_v19 }
 0x16d   : > { %v609_v34 = vpop.f32.mrb[20].mxu0  ;;  %1451 = vmatpush3.bf16.xpose.msra.mxu1 %v853_v31  ;;  %1482 = vmatprep.subr.bf16.mxu0 %v2164_v29 }
 0x16e   : > { %v723_v33 = vadd.f32 %v722_v0, %v609_v34  ;;  %807 = vrot.lane.b32.xlu0 %v779_v32, %s1814_s24  ;;  %v611_v35 = vpop.f32.mrb[21].mxu0  ;;  %1483 = vmatpush3.bf16.msra.mxu0 %v2164_v29  ;;  %v968_v34 = vadd.s32 48, %v2205_v19 }
 0x16f   : > { %v725_v36 = vadd.f32 %v2144_v50, %v611_v35  ;;  %v613_v37 = vpop.f32.mrb[22].mxu0  ;;  %v966_v35 = vadd.s32 32, %v2205_v19 }
 0x170   : > { %v727_v39 = vadd.f32 %v726_v54, %v613_v37  ;;  %v615_v40 = vpop.f32.mrb[23].mxu0  ;;  %v769_v42 = vmul.f32 0.125, %v723_v33 }
 0x171   : > { %v729_v41 = vadd.f32 %v728_v56, %v615_v40 }
 0x172   : > { %v756_v43 = vpack.c.bf16 %v727_v39, %v723_v33  ;;  %v770_v44 = vmul.f32 0.125, %v727_v39  ;;  %v967_v33 = vadd.s32 40, %v2205_v19 }
 0x173   : > { %v2172_v45 = vpack.c.bf16 %v729_v41, %v725_v36 }
 0x174   : > { %1559 = vmatprep.subr.msk.bf16.mxu1 %vm815_vm0, %v756_v43  ;;  %v856_v46 = vsel %vm815_vm0, %v756_v43, 0  ;;  %v780_v47 = vpack.c.bf16 %v770_v44, %v769_v42  ;;  %v972_v44 = vadd.s32 80, %v2205_v19 }
 0x175   : > { %v619_v48 = vpop.f32.mrb[24].mxu0  ;;  %1453 = vmatpush3.bf16.xpose.msra.mxu1 %v856_v46  ;;  %1484 = vmatprep.subr.bf16.mxu0 %v2172_v45  ;;  %v973_v46 = vadd.s32 88, %v2205_v19 }
 0x176   : > { %v733_v0 = vadd.f32 %v732_v3, %v619_v48  ;;  %809 = vrot.lane.b32.xlu1 %v780_v47, %s1814_s24  ;;  %v621_v49 = vpop.f32.mrb[25].mxu0  ;;  %1485 = vmatpush3.bf16.msra.mxu0 %v2172_v45 }
 0x177   : > { %v735_v50 = vadd.f32 %v734_v5, %v621_v49  ;;  %v623_v51 = vpop.f32.mrb[26].mxu0 }
 0x178   : > { %v737_v52 = vadd.f32 %v736_v9, %v623_v51  ;;  %v625_v53 = vpop.f32.mrb[27].mxu0  ;;  %v771_v56 = vmul.f32 0.125, %v733_v0 }
 0x179   : > { %v739_v54 = vadd.f32 %v738_v11, %v625_v53 }
 0x17a   : > { %v757_v57 = vpack.c.bf16 %v737_v52, %v733_v0  ;;  %v772_v58 = vmul.f32 0.125, %v737_v52  ;;  %v971_v52 = vadd.s32 72, %v2205_v19 }
 0x17b   : > { %v789_v59 = vpack.c.bf16 %v739_v54, %v735_v50  ;;  %v969_v54 = vadd.s32 56, %v2205_v19 }
 0x17c   : > { %1560 = vmatprep.subr.msk.bf16.mxu1 %vm815_vm0, %v757_v57  ;;  %v859_v60 = vsel %vm815_vm0, %v757_v57, 0  ;;  %v781_v61 = vpack.c.bf16 %v772_v58, %v771_v56  ;;  %v974_v57 = vadd.s32 96, %v2205_v19  ;;  %v975_v58 = vadd.s32 104, %v2205_v19 }
 0x17d   : > { %v629_v62 = vpop.f32.mrb[28].mxu0  ;;  %1455 = vmatpush3.bf16.xpose.msra.mxu1 %v859_v60  ;;  %1486 = vmatprep.subr.bf16.mxu0 %v789_v59  ;;  %v976_v60 = vadd.s32 112, %v2205_v19 }
 0x17e   : > { %v743_v63 = vadd.f32 %v742_v22, %v629_v62  ;;  %811 = vrot.lane.b32.xlu0 %v781_v61, %s1814_s24  ;;  %v631_v1 = vpop.f32.mrb[29].mxu0  ;;  %1487 = vmatpush3.bf16.msra.mxu0 %v789_v59  ;;  %v2208_v22 = vand.u32 127, %v961_v18 }
 0x17f   : > { %v745_v2 = vadd.f32 %v744_v24, %v631_v1  ;;  %v633_v3 = vpop.f32.mrb[30].mxu0  ;;  %v965_v24 = vadd.s32 24, %v2205_v19 }
 0x180   : > { %v747_v4 = vadd.f32 %v746_v28, %v633_v3  ;;  %v635_v5 = vpop.f32.mrb[31].mxu0  ;;  %v773_v7 = vmul.f32 0.125, %v743_v63  ;;  %vm982_vm1 = vcmp.le.s32.totalorder %v2208_v22, %v964_v21  ;;  %vm980_vm2 = vcmp.le.s32.totalorder %v2208_v22, %v2205_v19 }
 0x181   : > { %v749_v6 = vadd.f32 %v748_v30, %v635_v5  ;;  %vm981_vm3 = vcmp.le.s32.totalorder %v2208_v22, %v963_v23  ;;  %vm983_vm4 = vcmp.le.s32.totalorder %v2208_v22, %v965_v24  ;;  %vm986_vm5 = vcmp.le.s32.totalorder %v2208_v22, %v968_v34 }
 0x182   : > { %v758_v8 = vpack.c.bf16 %v747_v4, %v743_v63  ;;  %v774_v9 = vmul.f32 0.125, %v747_v4  ;;  %vm985_vm6 = vcmp.le.s32.totalorder %v2208_v22, %v967_v33  ;;  %vm984_vm7 = vcmp.le.s32.totalorder %v2208_v22, %v966_v35 }
 0x183   : > { %v790_v11 = vpack.c.bf16 %v749_v6, %v745_v2  ;;  %vm990_vm8 = vcmp.le.s32.totalorder %v2208_v22, %v972_v44  ;;  %vm991_vm10 = vcmp.le.s32.totalorder %v2208_v22, %v973_v46  ;;  %vm989_vm11 = vcmp.le.s32.totalorder %v2208_v22, %v971_v52 }
 0x184   : > { %1561 = vmatprep.subr.msk.bf16.mxu1 %vm815_vm0, %v758_v8  ;;  %v862_v12 = vsel %vm815_vm0, %v758_v8, 0  ;;  %v782_v13 = vpack.c.bf16 %v774_v9, %v773_v7  ;;  %vm987_vm12 = vcmp.le.s32.totalorder %v2208_v22, %v969_v54  ;;  %vm992_vm13 = vcmp.le.s32.totalorder %v2208_v22, %v974_v57 }
 0x185   : > { %1457 = vmatpush3.bf16.xpose.msra.mxu1 %v862_v12  ;;  %1488 = vmatprep.subr.bf16.mxu0 %v790_v11  ;;  %vm993_vm14 = vcmp.le.s32.totalorder %v2208_v22, %v975_v58  ;;  %v977_v63 = vadd.s32 120, %v2205_v19  ;;  %vm994_vm15 = vcmp.le.s32.totalorder %v2208_v22, %v976_v60 }
 0x186   : > { %813 = vrot.lane.b32.xlu1 %v782_v13, %s1814_s24  ;;  %1506 = vmatprep.subr.bf16.mxu1 %v2126_v20 }
 0x187   : > { %1489 = vmatpush3.bf16.msra.mxu0 %v790_v11 }
 0x1c0   : > { %v800_v14 = vpop.permute.xlu0 %799 }
 0x1c1   : > { %1458 = vmatprep.mubr.msk.bf16.mxu1 %vm815_vm0, %v800_v14 }
 0x1c8   : > { %v802_v15 = vpop.permute.xlu0 %801 }
 0x1c9   : > { %1459 = vmatmul.mubr.msk.bf16.vlgmr.msra.gmra.mrb[32].mxu1 %vm815_vm0, %v802_v15 }
 0x1ca   : > { %1514 = vmatpush3.bf16.msra.mxu1 %v2126_v20 }
 0x1cb   : > { %1507 = vmatprep.subr.bf16.mxu1 %v2137_v38 }
 0x1ce   : > { %1515 = vmatpush3.bf16.msra.mxu1 %v2137_v38 }
 0x1cf   : > { %1508 = vmatprep.subr.bf16.mxu1 %v2146_v55 }
 0x1d0   : > { %v804_v16 = vpop.permute.xlu1 %803 }
 0x1d1   : > { %1462 = vmatprep.mubr.msk.bf16.mxu1 %vm815_vm0, %v804_v16 }
 0x1d2   : > { %1516 = vmatpush3.bf16.msra.mxu1 %v2146_v55 }
 0x1d3   : > { %1509 = vmatprep.subr.bf16.mxu1 %v2156_v10 }
 0x1d6   : > { %1517 = vmatpush3.bf16.msra.mxu1 %v2156_v10 }
 0x1d7   : > { %1510 = vmatprep.subr.bf16.mxu1 %v2164_v29 }
 0x1d8   : > { %v806_v17 = vpop.permute.xlu1 %805 }
 0x1d9   : > { %1463 = vmatmul.mubr.msk.bf16.gmra.mrb[36].mxu1 %vm815_vm0, %v806_v17 }
 0x1da   : > { %1518 = vmatpush3.bf16.msra.mxu1 %v2164_v29 }
 0x1db   : > { %1511 = vmatprep.subr.bf16.mxu1 %v2172_v45 }
 0x1de   : > { %1519 = vmatpush3.bf16.msra.mxu1 %v2172_v45  ;;  %v970_v45 = vadd.s32 64, %v2205_v19 }
 0x1df   : > { %1512 = vmatprep.subr.bf16.mxu1 %v789_v59 }
 0x1e0   : > { %v808_v20 = vpop.permute.xlu0 %807  ;;  %vm988_vm9 = vcmp.le.s32.totalorder %v2208_v22, %v970_v45 }
 0x1e1   : > { %1466 = vmatprep.mubr.msk.bf16.mxu1 %vm815_vm0, %v808_v20 }
 0x1e2   : > { %1520 = vmatpush3.bf16.msra.mxu1 %v789_v59 }
 0x1e3   : > { %1513 = vmatprep.subr.bf16.mxu1 %v790_v11 }
 0x1e6   : > { %1521 = vmatpush3.bf16.msra.mxu1 %v790_v11 }
 0x1e8   : > { %v810_v38 = vpop.permute.xlu1 %809 }
 0x1e9   : > { %1467 = vmatmul.mubr.msk.bf16.gmra.mrb[40].mxu1 %vm815_vm0, %v810_v38 }
 0x1f0   : > { %v812_v55 = vpop.permute.xlu0 %811 }
 0x1f1   : > { %1470 = vmatprep.mubr.msk.bf16.mxu1 %vm815_vm0, %v812_v55 }
 0x1f8   : > { %v814_v10 = vpop.permute.xlu1 %813 }
 0x1f9   : > { %1471 = vmatmul.mubr.msk.bf16.gmra.mrb[44].mxu1 %vm815_vm0, %v814_v10 }
 0x29c   : > { %v1460_v25 = vpop.f32.mrb[32].mxu1 }
 0x29d   : > { %v898_v26 = vpop.f32.mrb[33].mxu1  ;;  %v2215_v27 = vsel %vm982_vm1, %v1460_v25, -inf  ;;  %vm995_vm1 = vcmp.le.s32.totalorder %v2208_v22, %v977_v63 }
 0x29e   : > { %1016 = vmax.xlane.f32.xlu1 %v2215_v27  ;;  %v1461_v28 = vpop.f32.mrb[34].mxu1  ;;  %v2219_v29 = vsel %vm980_vm2, %v898_v26, -inf }
 0x29f   : > { %1012 = vmax.xlane.f32.xlu0 %v2219_v29  ;;  %v901_v30 = vpop.f32.mrb[35].mxu1  ;;  %v2226_v32 = vsel %vm983_vm4, %v1461_v28, -inf }
 0x2a0   : > { %v2223_v31 = vsel %vm981_vm3, %v901_v30, -inf }
 0x2a2   : > { %1014 = vmax.xlane.f32.xlu1 %v2223_v31 }
 0x2a3   : > { %1018 = vmax.xlane.f32.xlu0 %v2226_v32 }
 0x2ac   : > { %v1464_v36 = vpop.f32.mrb[36].mxu1 }
 0x2ad   : > { %v914_v37 = vpop.f32.mrb[37].mxu1  ;;  %v2233_v39 = vsel %vm986_vm5, %v1464_v36, -inf }
 0x2ae   : > { %1024 = vmax.xlane.f32.xlu1 %v2233_v39  ;;  %v1465_v40 = vpop.f32.mrb[38].mxu1  ;;  %v2241_v43 = vsel %vm984_vm7, %v914_v37, -inf }
 0x2af   : > { %v917_v41 = vpop.f32.mrb[39].mxu1  ;;  %v2268_v59 = vsel %vm987_vm12, %v1465_v40, -inf }
 0x2b0   : > { %v2238_v42 = vsel %vm985_vm6, %v917_v41, -inf }
 0x2b1   : > { %1022 = vmax.xlane.f32.xlu0 %v2238_v42 }
 0x2b2   : > { %1020 = vmax.xlane.f32.xlu1 %v2241_v43 }
 0x2bc   : > { %v1468_v47 = vpop.f32.mrb[40].mxu1 }
 0x2bd   : > { %v930_v48 = vpop.f32.mrb[41].mxu1  ;;  %v2249_v0 = vsel %vm990_vm8, %v1468_v47, -inf }
 0x2be   : > { %1032 = vmax.xlane.f32.xlu1 %v2249_v0  ;;  %v1469_v49 = vpop.f32.mrb[42].mxu1  ;;  %v2252_v50 = vsel %vm988_vm9, %v930_v48, -inf }
 0x2bf   : > { %1028 = vmax.xlane.f32.xlu0 %v2252_v50  ;;  %v933_v51 = vpop.f32.mrb[43].mxu1  ;;  %v2257_v53 = vsel %vm991_vm10, %v1469_v49, -inf }
 0x2c0   : > { %v2262_v56 = vsel %vm989_vm11, %v933_v51, -inf }
 0x2c3   : > { %1034 = vmax.xlane.f32.xlu0 %v2257_v53 }
 0x2c7   : > { %1030 = vmax.xlane.f32.xlu0 %v2262_v56 }
 0x2cb   : > { %1026 = vmax.xlane.f32.xlu0 %v2268_v59 }
 0x2cc   : > { %v1472_v61 = vpop.f32.mrb[44].mxu1 }
 0x2cd   : > { %v946_v62 = vpop.f32.mrb[45].mxu1  ;;  %v2283_v5 = vsel %vm994_vm15, %v1472_v61, -inf }
 0x2ce   : > { %v1473_v1 = vpop.f32.mrb[46].mxu1  ;;  %v2275_v2 = vsel %vm992_vm13, %v946_v62, -inf }
 0x2cf   : > { %1036 = vmax.xlane.f32.xlu1 %v2275_v2  ;;  %v949_v3 = vpop.f32.mrb[47].mxu1  ;;  %v2286_v6 = vsel %vm995_vm1, %v1473_v1, -inf }
 0x2d0   : > { %v2279_v4 = vsel %vm993_vm14, %v949_v3, -inf }
 0x2d1   : > { %1038 = vmax.xlane.f32.xlu0 %v2279_v4 }
 0x2d3   : > { %1040 = vmax.xlane.f32.xlu1 %v2283_v5 }
 0x2d5   : > { %1042 = vmax.xlane.f32.xlu0 %v2286_v6 }
 0x32b   : > { %v1017_v7 = vpop.xlane.xlu1 %1016 }
 0x32c   : > { %v1046_v8 = vsub.f32 %v2215_v27, %v1017_v7  ;;  %v1013_v9 = vpop.xlane.xlu0 %1012 }
 0x32d   : > { %v1044_v11 = vsub.f32 %v2219_v29, %v1013_v9 }
 0x32e   : > { %v1064_v12 = vmul.f32 1.442695, %v1046_v8 }
 0x32f   : > { %v1015_v13 = vpop.xlane.xlu1 %1014  ;;  %v1060_v14 = vmul.f32 1.442695, %v1044_v11 }
 0x330   : > { %1680 = vpow2.f32 %v1064_v12  ;;  %v1019_v15 = vpop.xlane.xlu0 %1018  ;;  %v1045_v16 = vsub.f32 %v2223_v31, %v1015_v13 }
 0x331   : > { %v1047_v17 = vsub.f32 %v2226_v32, %v1019_v15  ;;  %1682 = vpow2.f32 %v1060_v14 }
 0x332   : > { %v1062_v38 = vmul.f32 1.442695, %v1045_v16 }
 0x333   : > { %v1066_v20 = vmul.f32 1.442695, %v1047_v17 }
 0x335   : > { %1684 = vpow2.f32 %v1066_v20 }
 0x336   : > { %1686 = vpow2.f32 %v1062_v38 }
 0x33a   : > { %v2293_v55 = vpop.eup %1680 }
 0x33b   : > { %v1025_v10 = vpop.xlane.xlu1 %1024  ;;  %1096 = vadd.xlane.f32.xlu1 %v2293_v55  ;;  %v2296_v18 = vpop.eup %1682 }
 0x33c   : > { %v1050_v35 = vsub.f32 %v2233_v39, %v1025_v10 }
 0x33e   : > { %v1023_v19 = vpop.xlane.xlu0 %1022 }
 0x33f   : > { %v2298_v21 = vpop.eup %1684  ;;  %v1049_v22 = vsub.f32 %v2238_v42, %v1023_v19  ;;  %v1021_v23 = vpop.xlane.xlu1 %1020  ;;  %1092 = vadd.xlane.f32.xlu1 %v2296_v18  ;;  %v1072_v42 = vmul.f32 1.442695, %v1050_v35 }
 0x340   : > { %v1048_v24 = vsub.f32 %v2241_v43, %v1021_v23  ;;  %1098 = vadd.xlane.f32.xlu0 %v2298_v21  ;;  %v2304_v27 = vpop.eup %1686 }
 0x341   : > { %v1070_v25 = vmul.f32 1.442695, %v1049_v22 }
 0x342   : > { %v1068_v26 = vmul.f32 1.442695, %v1048_v24 }
 0x343   : > { %1688 = vpow2.f32 %v1070_v25 }
 0x344   : > { %1690 = vpow2.f32 %v1068_v26  ;;  %1094 = vadd.xlane.f32.xlu0 %v2304_v27 }
 0x34b   : > { %v1033_v28 = vpop.xlane.xlu1 %1032 }
 0x34c   : > { %v1054_v29 = vsub.f32 %v2249_v0, %v1033_v28  ;;  %v1029_v30 = vpop.xlane.xlu0 %1028 }
 0x34d   : > { %v2308_v31 = vpop.eup %1688  ;;  %v1052_v32 = vsub.f32 %v2252_v50, %v1029_v30 }
 0x34e   : > { %v2311_v34 = vpop.eup %1690  ;;  %v1080_v33 = vmul.f32 1.442695, %v1054_v29  ;;  %1102 = vadd.xlane.f32.xlu0 %v2308_v31 }
 0x34f   : > { %1100 = vadd.xlane.f32.xlu1 %v2311_v34  ;;  %v1076_v36 = vmul.f32 1.442695, %v1052_v32 }
 0x350   : > { %1692 = vpow2.f32 %v1080_v33  ;;  %v1035_v37 = vpop.xlane.xlu0 %1034 }
 0x351   : > { %v1055_v40 = vsub.f32 %v2257_v53, %v1035_v37  ;;  %1694 = vpow2.f32 %v1076_v36 }
 0x353   : > { %v1082_v41 = vmul.f32 1.442695, %v1055_v40 }
 0x354   : > { %v1031_v43 = vpop.xlane.xlu0 %1030 }
 0x355   : > { %1696 = vpow2.f32 %v1082_v41  ;;  %v1053_v44 = vsub.f32 %v2262_v56, %v1031_v43 }
 0x356   : > { %1698 = vpow2.f32 %v1072_v42 }
 0x357   : > { %v1078_v45 = vmul.f32 1.442695, %v1053_v44 }
 0x358   : > { %v1027_v46 = vpop.xlane.xlu0 %1026 }
 0x359   : > { %1700 = vpow2.f32 %v1078_v45  ;;  %v1051_v47 = vsub.f32 %v2268_v59, %v1027_v46 }
 0x35a   : > { %v2319_v48 = vpop.eup %1692 }
 0x35b   : > { %v1074_v39 = vmul.f32 1.442695, %v1051_v47  ;;  %1112 = vadd.xlane.f32.xlu1 %v2319_v48  ;;  %v2323_v50 = vpop.eup %1694 }
 0x35c   : > { %v1037_v0 = vpop.xlane.xlu1 %1036 }
 0x35d   : > { %1702 = vpow2.f32 %v1074_v39  ;;  %v1056_v49 = vsub.f32 %v2275_v2, %v1037_v0 }
 0x35e   : > { %v1039_v51 = vpop.xlane.xlu0 %1038 }
 0x35f   : > { %v2325_v52 = vpop.eup %1696  ;;  %v1084_v53 = vmul.f32 1.442695, %v1056_v49  ;;  %v1057_v54 = vsub.f32 %v2279_v4, %v1039_v51  ;;  %1108 = vadd.xlane.f32.xlu1 %v2323_v50 }
 0x360   : > { %v1041_v56 = vpop.xlane.xlu1 %1040  ;;  %1114 = vadd.xlane.f32.xlu0 %v2325_v52  ;;  %v2331_v59 = vpop.eup %1698 }
 0x361   : > { %1704 = vpow2.f32 %v1084_v53  ;;  %v1086_v57 = vmul.f32 1.442695, %v1057_v54  ;;  %v1058_v58 = vsub.f32 %v2283_v5, %v1041_v56 }
 0x362   : > { %v1043_v60 = vpop.xlane.xlu0 %1042 }
 0x363   : > { %v2333_v61 = vpop.eup %1700  ;;  %1706 = vpow2.f32 %v1086_v57  ;;  %v1088_v62 = vmul.f32 1.442695, %v1058_v58  ;;  %v1059_v63 = vsub.f32 %v2286_v6, %v1043_v60  ;;  %1104 = vadd.xlane.f32.xlu1 %v2331_v59 }
 0x364   : > { %1110 = vadd.xlane.f32.xlu0 %v2333_v61 }
 0x365   : > { %1708 = vpow2.f32 %v1088_v62  ;;  %v1090_v1 = vmul.f32 1.442695, %v1059_v63 }
 0x367   : > { %v2338_v2 = vpop.eup %1702  ;;  %1710 = vpow2.f32 %v1090_v1 }
 0x368   : > { %1106 = vadd.xlane.f32.xlu0 %v2338_v2 }
 0x36b   : > { %v2341_v3 = vpop.eup %1704 }
 0x36c   : > { %1116 = vadd.xlane.f32.xlu1 %v2341_v3 }
 0x36d   : > { %v2344_v4 = vpop.eup %1706 }
 0x36e   : > { %1118 = vadd.xlane.f32.xlu0 %v2344_v4 }
 0x36f   : > { %v2347_v5 = vpop.eup %1708 }
 0x370   : > { %1120 = vadd.xlane.f32.xlu1 %v2347_v5 }
 0x371   : > { %v2350_v6 = vpop.eup %1710 }
 0x372   : > { %1122 = vadd.xlane.f32.xlu0 %v2350_v6 }
 0x3c8   : > { %v1097_v7 = vpop.xlane.xlu1 %1096 }
 0x3cc   : > { %v1093_v8 = vpop.xlane.xlu1 %1092 }
 0x3cd   : > { %v1099_v9 = vpop.xlane.xlu0 %1098 }
 0x3ce   : > { %1712 = vrcp.f32 %v1099_v9 }
 0x3cf   : > { %1714 = vrcp.f32 %v1093_v8 }
 0x3d0   : > { %1716 = vrcp.f32 %v1097_v7 }
 0x3d1   : > { %v1095_v11 = vpop.xlane.xlu0 %1094 }
 0x3d2   : > { %1718 = vrcp.f32 %v1095_v11 }
 0x3d8   : > { %v1713_v12 = vpop.eup %1712 }
 0x3d9   : > { %v1715_v13 = vpop.eup %1714  ;;  %v1143_v17 = vmul.f32 %v1713_v12, %v2298_v21 }
 0x3da   : > { %v1717_v14 = vpop.eup %1716  ;;  %v1140_v38 = vmul.f32 %v1715_v13, %v2296_v18 }
 0x3db   : > { %v1103_v15 = vpop.xlane.xlu0 %1102  ;;  %v1142_v19 = vmul.f32 %v1717_v14, %v2293_v55 }
 0x3dc   : > { %v1719_v16 = vpop.eup %1718  ;;  %1720 = vrcp.f32 %v1103_v15  ;;  %v1101_v20 = vpop.xlane.xlu1 %1100 }
 0x3dd   : > { %1722 = vrcp.f32 %v1101_v20  ;;  %v1141_v10 = vmul.f32 %v1719_v16, %v2304_v27  ;;  %v1157_v23 = vpack.c.bf16 %v1143_v17, %v1142_v19 }
 0x3df   : > { %v1156_v22 = vpack.c.bf16 %v1141_v10, %v1140_v38 }
 0x3e1   : > { %1490 = vmatprep.mubr.bf16.mxu0 %v1156_v22 }
 0x3e2   : > { %1491 = vmatmul.mubr.bf16.vlgmr.msra.gmra.mrb[32].mxu0 %v1157_v23 }
 0x3e6   : > { %v1721_v24 = vpop.eup %1720 }
 0x3e7   : > { %v1723_v25 = vpop.eup %1722  ;;  %v1145_v26 = vmul.f32 %v1721_v24, %v2308_v31 }
 0x3e8   : > { %v1113_v28 = vpop.xlane.xlu1 %1112  ;;  %v1144_v21 = vmul.f32 %v1723_v25, %v2311_v34 }
 0x3ea   : > { %v1158_v29 = vpack.c.bf16 %v1145_v26, %v1144_v21 }
 0x3ec   : > { %v1109_v30 = vpop.xlane.xlu1 %1108  ;;  %1494 = vmatprep.mubr.bf16.mxu0 %v1158_v29 }
 0x3ed   : > { %v1115_v32 = vpop.xlane.xlu0 %1114 }
 0x3ee   : > { %1724 = vrcp.f32 %v1115_v32 }
 0x3ef   : > { %1726 = vrcp.f32 %v1109_v30 }
 0x3f0   : > { %1728 = vrcp.f32 %v1113_v28  ;;  %v1105_v18 = vpop.xlane.xlu1 %1104 }
 0x3f1   : > { %v1111_v55 = vpop.xlane.xlu0 %1110 }
 0x3f2   : > { %1730 = vrcp.f32 %v1111_v55 }
 0x3f3   : > { %1732 = vrcp.f32 %v1105_v18 }
 0x3f5   : > { %v1107_v27 = vpop.xlane.xlu0 %1106 }
 0x3f6   : > { %1734 = vrcp.f32 %v1107_v27 }
 0x3f8   : > { %v1725_v33 = vpop.eup %1724 }
 0x3f9   : > { %v1117_v35 = vpop.xlane.xlu1 %1116  ;;  %v1727_v36 = vpop.eup %1726  ;;  %v1151_v40 = vmul.f32 %v1725_v33, %v2325_v52 }
 0x3fa   : > { %1736 = vrcp.f32 %v1117_v35  ;;  %v1729_v31 = vpop.eup %1728  ;;  %v1148_v42 = vmul.f32 %v1727_v36, %v2323_v50 }
 0x3fb   : > { %v1119_v37 = vpop.xlane.xlu0 %1118  ;;  %v1150_v45 = vmul.f32 %v1729_v31, %v2319_v48 }
 0x3fc   : > { %v1731_v34 = vpop.eup %1730  ;;  %1738 = vrcp.f32 %v1119_v37 }
 0x3fd   : > { %v1121_v41 = vpop.xlane.xlu1 %1120  ;;  %v1149_v43 = vmul.f32 %v1731_v34, %v2333_v61  ;;  %v1733_v44 = vpop.eup %1732  ;;  %v1161_v0 = vpack.c.bf16 %v1151_v40, %v1150_v45 }
 0x3fe   : > { %1740 = vrcp.f32 %v1121_v41  ;;  %v1146_v49 = vmul.f32 %v1733_v44, %v2331_v59 }
 0x3ff   : > { %v1123_v46 = vpop.xlane.xlu0 %1122  ;;  %v1160_v47 = vpack.c.bf16 %v1149_v43, %v1148_v42 }
 0x400   : > { %v1735_v39 = vpop.eup %1734  ;;  %1742 = vrcp.f32 %v1123_v46 }
 0x401   : > { %1498 = vmatprep.mubr.bf16.mxu1 %v1160_v47  ;;  %v1147_v51 = vmul.f32 %v1735_v39, %v2338_v2 }
 0x402   : > { %1499 = vmatmul.mubr.bf16.vlgmr.msra.gmra.mrb[48].mxu1 %v1161_v0 }
 0x403   : > { %v1159_v50 = vpack.c.bf16 %v1147_v51, %v1146_v49 }
 0x404   : > { %v1737_v52 = vpop.eup %1736 }
 0x405   : > { %1495 = vmatmul.mubr.bf16.gmra.mrb[36].mxu0 %v1159_v50  ;;  %v1152_v48 = vmul.f32 %v1737_v52, %v2341_v3 }
 0x406   : > { %v1739_v53 = vpop.eup %1738 }
 0x407   : > { %v1153_v54 = vmul.f32 %v1739_v53, %v2344_v4 }
 0x408   : > { %v1741_v56 = vpop.eup %1740 }
 0x409   : > { %v1162_v57 = vpack.c.bf16 %v1153_v54, %v1152_v48  ;;  %v1154_v60 = vmul.f32 %v1741_v56, %v2347_v5 }
 0x40a   : > { %v1743_v58 = vpop.eup %1742 }
 0x40b   : > { %1502 = vmatprep.mubr.bf16.mxu1 %v1162_v57  ;;  %v1155_v59 = vmul.f32 %v1743_v58, %v2350_v6 }
 0x40d   : > { %v1163_v61 = vpack.c.bf16 %v1155_v59, %v1154_v60 }
 0x40f   : > { %1503 = vmatmul.mubr.bf16.gmra.mrb[52].mxu1 %v1163_v61 }
 0x4b5   : > { %v1492_v62 = vpop.f32.mrb[32].mxu0 }
 0x4b6   : > { %1263 = vst.msk [vmem:[%s2374_s5 + $0x10] sm:$0xff] %vm815_vm0, %v1492_v62  ;;  %v1198_v63 = vpop.f32.mrb[33].mxu0 }
 0x4b7   : > { %1261 = vst.msk [vmem:[%s2374_s5] sm:$0xff] %vm815_vm0, %v1198_v63  ;;  %v1493_v1 = vpop.f32.mrb[34].mxu0 }
 0x4b8   : > { %1264 = vst.msk [vmem:[%s2374_s5 + $0x18] sm:$0xff] %vm815_vm0, %v1493_v1  ;;  %v1201_v2 = vpop.f32.mrb[35].mxu0 }
 0x4b9   : > { %1262 = vst.msk [vmem:[%s2374_s5 + $0x8] sm:$0xff] %vm815_vm0, %v1201_v2 }
 0x4d5   : > { %v1500_v3 = vpop.f32.mrb[48].mxu1 }
 0x4d6   : > { %1271 = vst.msk [vmem:[%s2374_s5 + $0x50] sm:$0xff] %vm815_vm0, %v1500_v3  ;;  %v1230_v4 = vpop.f32.mrb[49].mxu1 }
 0x4d7   : > { %1269 = vst.msk [vmem:[%s2374_s5 + $0x40] sm:$0xff] %vm815_vm0, %v1230_v4  ;;  %v1501_v5 = vpop.f32.mrb[50].mxu1 }
 0x4d8   : > { %1272 = vst.msk [vmem:[%s2374_s5 + $0x58] sm:$0xff] %vm815_vm0, %v1501_v5  ;;  %v1496_v6 = vpop.f32.mrb[36].mxu0  ;;  %v1233_v7 = vpop.f32.mrb[51].mxu1 }
 0x4d9   : > { %1267 = vst.msk [vmem:[%s2374_s5 + $0x30] sm:$0xff] %vm815_vm0, %v1496_v6  ;;  %1270 = vst.msk [vmem:[%s2374_s5 + $0x48] sm:$0xff] %vm815_vm0, %v1233_v7  ;;  %v1214_v8 = vpop.f32.mrb[37].mxu0 }
 0x4da   : > { %1265 = vst.msk [vmem:[%s2374_s5 + $0x20] sm:$0xff] %vm815_vm0, %v1214_v8  ;;  %v1497_v9 = vpop.f32.mrb[38].mxu0 }
 0x4db   : > { %1268 = vst.msk [vmem:[%s2374_s5 + $0x38] sm:$0xff] %vm815_vm0, %v1497_v9  ;;  %v1217_v11 = vpop.f32.mrb[39].mxu0 }
 0x4dc   : > { %1266 = vst.msk [vmem:[%s2374_s5 + $0x28] sm:$0xff] %vm815_vm0, %v1217_v11 }
 0x4e2   : > { %v1504_v12 = vpop.f32.mrb[52].mxu1 }
 0x4e3   : > { %1275 = vst.msk [vmem:[%s2374_s5 + $0x70] sm:$0xff] %vm815_vm0, %v1504_v12  ;;  %v1246_v13 = vpop.f32.mrb[53].mxu1 }
 0x4e4   : > { %1273 = vst.msk [vmem:[%s2374_s5 + $0x60] sm:$0xff] %vm815_vm0, %v1246_v13  ;;  %v1505_v14 = vpop.f32.mrb[54].mxu1 }
 0x4e5   : > { %1276 = vst.msk [vmem:[%s2374_s5 + $0x78] sm:$0xff] %vm815_vm0, %v1505_v14  ;;  %v1249_v15 = vpop.f32.mrb[55].mxu1 }
 0x4e6   : > { %1274 = vst.msk [vmem:[%s2374_s5 + $0x68] sm:$0xff] %vm815_vm0, %v1249_v15 }
 0x4e7 PF: > { %p12_p8 = scmp.ge.s32.totalorder %s1852_s14, 4   ;;  %s2427_s9 = smov %s1800_s10 }
 0x4e8   : > { %s2428_s10 = smov %s1804_s11  ;;  %s2429_s11 = smov %s1862_s17 }
 0x4e9   : > { %s2430_s12 = smov %s1852_s14  ;;  %14 = sbr.rel (!%p12_p8) target bundleno = 3 (0x3), region = 68 }
 0x4f0   :  { %1298 = vsyncpa [#allocation3], 1 }
 0x4f1   :  { %1300 = vsyncpa [#allocation3 + $0x1], 1 }

</bundles_post_ra>
